<compile_context>
chip_gen: v5e
topology: v5e:2x2
jax: 0.10.0
libtpu: 0.0.40
codegen_flags: <defaults>
</compile_context>

<pallas_src>
import jax
import jax.numpy as jnp
from jax.experimental import pallas as pl
from jax.experimental.pallas import tpu as pltpu

D_IN = 215   # NIR spectrum length (LayerNorm / Linear input dim)
D_OUT = 64   # Linear output dim
LN_EPS = 1e-5


def nir_kernel(x_ref, w_ref, b_ref, o_ref):
    # x_ref: (TB, 215), w_ref: (215, 64) folded weight, b_ref: (1, 64) folded
    # bias, o_ref: (TB, 64).
    x = x_ref[...].astype(jnp.float32)

    # LayerNorm statistics over the last dim (biased variance, matching
    # torch.nn.LayerNorm). The affine (gamma/beta) is folded into w_ref/b_ref.
    mean = jnp.mean(x, axis=-1, keepdims=True)
    centered = x - mean
    var = jnp.mean(centered * centered, axis=-1, keepdims=True)
    xn = centered * jax.lax.rsqrt(var + LN_EPS)

    # Linear (with folded LN affine) + ReLU, f32 accumulation on the MXU.
    out = jnp.dot(xn, w_ref[...], preferred_element_type=jnp.float32) + b_ref[...]
    o_ref[...] = jnp.maximum(out, 0.0).astype(o_ref.dtype)


def nir_feature_extractor(x, gamma, beta, w_t, b, *, tile_b=2048):
    """Fused LayerNorm(215) -> Linear(215, 64) -> ReLU.

    x:     (B, 215) float32
    gamma: (215,)   LayerNorm weight
    beta:  (215,)   LayerNorm bias
    w_t:   (215, 64) Linear weight, transposed from PyTorch's (64, 215)
    b:     (64,)    Linear bias
    Returns (B, 64) float32.  (squeeze(-1) is a no-op since the last dim is 64.)
    """
    B = x.shape[0]
    assert x.shape[1] == D_IN

    # Fold the LayerNorm affine into the linear layer (exact up to f32 rounding):
    #   (xn*gamma + beta) @ W^T + b == xn @ (gamma[:,None]*W^T) + (beta @ W^T + b)
    w_fold = gamma.astype(jnp.float32)[:, None] * w_t.astype(jnp.float32)
    b_fold = (beta.astype(jnp.float32) @ w_t.astype(jnp.float32)
              + b.astype(jnp.float32)).reshape(1, D_OUT)

    # Effective batch tile: multiple of 8 (sublane), <= requested, <= padded
    # batch, and (when the batch allows) small enough that the grid has >= 2
    # parallel steps so both TensorCores on v7x get work.
    SUB = 8
    b_pad8 = pl.cdiv(B, SUB) * SUB
    tb = max(SUB, min(tile_b, b_pad8))
    tb = (tb // SUB) * SUB
    if pl.cdiv(b_pad8, tb) < 2 and b_pad8 >= 2 * SUB:
        tb = pl.cdiv(pl.cdiv(b_pad8, 2), SUB) * SUB

    grid = (pl.cdiv(B, tb),)
    b_padded = grid[0] * tb
    if b_padded != B:
        # Zero rows are harmless: mean=0, var=0 -> xn = 0 * rsqrt(eps) = 0
        # (no NaN); padded rows are sliced off below.
        x = jnp.pad(x, ((0, b_padded - B), (0, 0)))

    # Explicit VMEM budget: double-buffered x/out tiles + resident folded
    # weight/bias + headroom, never below the smallest default scoped limit.
    per_step = 4 * (tb * D_IN + tb * D_OUT)
    vmem_bytes = int(max(2 * per_step + 4 * (D_IN * D_OUT + D_OUT) + (2 << 20),
                         16 << 20))

    out = pl.pallas_call(
        nir_kernel,
        out_shape=jax.ShapeDtypeStruct((b_padded, D_OUT), jnp.float32),
        grid_spec=pltpu.PrefetchScalarGridSpec(
            num_scalar_prefetch=0,
            grid=grid,
            in_specs=[
                pl.BlockSpec((tb, D_IN), lambda i: (i, 0)),     # x tile
                pl.BlockSpec((D_IN, D_OUT), lambda i: (0, 0)),  # folded W (resident)
                pl.BlockSpec((1, D_OUT), lambda i: (0, 0)),     # folded bias (resident)
            ],
            out_specs=pl.BlockSpec((tb, D_OUT), lambda i: (i, 0)),
        ),
        compiler_params=pltpu.CompilerParams(
            dimension_semantics=("parallel",),
            vmem_limit_bytes=vmem_bytes,
        ),
    )(x, w_fold, b_fold)

    return out[:B] if b_padded != B else out


def reference(x, gamma, beta, w_t, b):
    # Direct transcription of the PyTorch forward (affine applied before matmul).
    mean = jnp.mean(x, axis=-1, keepdims=True)
    var = jnp.mean((x - mean) ** 2, axis=-1, keepdims=True)
    xn = (x - mean) / jnp.sqrt(var + LN_EPS)
    y = xn * gamma + beta
    out = y @ w_t + b
    return jnp.maximum(out, 0.0)


if __name__ == "__main__":
    key = jax.random.PRNGKey(0)
    k_x, k_w, k_b, k_g, k_beta = jax.random.split(key, 5)

    B = 19  # small, deliberately NOT a multiple of 8 to exercise the ragged-tail path
    x = jax.random.normal(k_x, (B, D_IN), dtype=jnp.float32)

    # Deterministic parameter init (shapes from the module's __init__).
    gamma = jnp.ones((D_IN,), jnp.float32) + 0.01 * jax.random.normal(k_g, (D_IN,))
    beta = 0.01 * jax.random.normal(k_beta, (D_IN,))
    # nn.Linear(215, 64): weight (64, 215); we pass its transpose (215, 64).
    bound = 1.0 / (D_IN ** 0.5)
    w = jax.random.uniform(k_w, (D_OUT, D_IN), jnp.float32, -bound, bound)
    b = jax.random.uniform(k_b, (D_OUT,), jnp.float32, -bound, bound)
    w_t = w.T

    out = nir_feature_extractor(x, gamma, beta, w_t, b)
    out = jax.block_until_ready(out)

    ref = reference(x, gamma, beta, w_t, b)
    assert out.shape == (B, D_OUT)
    assert jnp.allclose(out, ref, atol=1e-4, rtol=1e-4), "mismatch vs reference"

    print("KERNEL_OK")
</pallas_src>

<mosaic_0001>
module attributes {stable_mosaic.version = 11 : i64} {
  func.func @nir_kernel(%arg0: i32, %arg1: memref<16x215xf32, #tpu.memory_space<vmem>>, %arg2: memref<215x64xf32, #tpu.memory_space<vmem>>, %arg3: memref<1x64xf32, #tpu.memory_space<vmem>>, %arg4: memref<16x64xf32, #tpu.memory_space<vmem>>) attributes {dimension_semantics = [#tpu.dimension_semantics<parallel>], iteration_bounds = array<i64: 2>, scalar_prefetch = 0 : i64, scratch_operands = 0 : i64, tpu.core_type = #tpu.core_type<tc>, window_params = [{transform_indices = @transform_0, window_bounds = array<i64: 16, 215>}, {pipeline_mode = #tpu.pipeline_mode<synchronous>, transform_indices = @transform_1, window_bounds = array<i64: 215, 64>}, {pipeline_mode = #tpu.pipeline_mode<synchronous>, transform_indices = @transform_2, window_bounds = array<i64: 1, 64>}, {transform_indices = @transform_3, window_bounds = array<i64: 16, 64>}]} {
    %c0 = arith.constant 0 : index
    %c0_0 = arith.constant 0 : index
    %0 = vector.load %arg1[%c0, %c0_0] : memref<16x215xf32, #tpu.memory_space<vmem>>, vector<16x215xf32>
    %cst = arith.constant dense<0.000000e+00> : vector<16xf32>
    %1 = vector.multi_reduction <add>, %0, %cst [1] : vector<16x215xf32> to vector<16xf32>
    %2 = vector.shape_cast %1 : vector<16xf32> to vector<16x1xf32>
    %cst_1 = arith.constant 2.150000e+02 : f32
    %3 = vector.broadcast %cst_1 : f32 to vector<16x1xf32>
    %4 = arith.divf %2, %3 : vector<16x1xf32>
    %5 = vector.broadcast %4 : vector<16x1xf32> to vector<16x215xf32>
    %6 = arith.subf %0, %5 : vector<16x215xf32>
    %7 = arith.mulf %6, %6 : vector<16x215xf32>
    %cst_2 = arith.constant dense<0.000000e+00> : vector<16xf32>
    %8 = vector.multi_reduction <add>, %7, %cst_2 [1] : vector<16x215xf32> to vector<16xf32>
    %9 = vector.shape_cast %8 : vector<16xf32> to vector<16x1xf32>
    %cst_3 = arith.constant 2.150000e+02 : f32
    %10 = vector.broadcast %cst_3 : f32 to vector<16x1xf32>
    %11 = arith.divf %9, %10 : vector<16x1xf32>
    %cst_4 = arith.constant 9.99999974E-6 : f32
    %12 = vector.broadcast %cst_4 : f32 to vector<16x1xf32>
    %13 = arith.addf %11, %12 : vector<16x1xf32>
    %14 = math.rsqrt %13 : vector<16x1xf32>
    %15 = vector.broadcast %14 : vector<16x1xf32> to vector<16x215xf32>
    %16 = arith.mulf %6, %15 : vector<16x215xf32>
    %c0_5 = arith.constant 0 : index
    %c0_6 = arith.constant 0 : index
    %17 = vector.load %arg2[%c0_5, %c0_6] : memref<215x64xf32, #tpu.memory_space<vmem>>, vector<215x64xf32>
    %cst_7 = arith.constant dense<0.000000e+00> : vector<16x64xf32>
    %18 = tpu.matmul %16, %17, %cst_7 {dimension_numbers = #tpu.dot_dimension_numbers<[1], [0], [0], [1], [0, 0, 1, 1], [], []>} : vector<16x215xf32>, vector<215x64xf32>, vector<16x64xf32> -> vector<16x64xf32>
    %c0_8 = arith.constant 0 : index
    %c0_9 = arith.constant 0 : index
    %19 = vector.load %arg3[%c0_8, %c0_9] : memref<1x64xf32, #tpu.memory_space<vmem>>, vector<1x64xf32>
    %20 = vector.broadcast %19 : vector<1x64xf32> to vector<16x64xf32>
    %21 = arith.addf %18, %20 : vector<16x64xf32>
    %cst_10 = arith.constant 0.000000e+00 : f32
    %22 = vector.broadcast %cst_10 : f32 to vector<16x64xf32>
    %23 = arith.maximumf %21, %22 : vector<16x64xf32>
    %c0_11 = arith.constant 0 : index
    %c0_12 = arith.constant 0 : index
    %24 = vector.load %arg4[%c0_11, %c0_12] : memref<16x64xf32, #tpu.memory_space<vmem>>, vector<16x64xf32>
    tpu.vector_store %arg4[%c0_11, %c0_12], %23 {strides = array<i32>} : memref<16x64xf32, #tpu.memory_space<vmem>>, vector<16x64xf32>,
    return
  }
  func.func @transform_0(%arg0: i32) -> (i32, i32) {
    %c0_i32 = arith.constant 0 : i32
    %c0_i32_0 = arith.constant 0 : i32
    return %arg0, %c0_i32 : i32, i32
  }
  func.func @transform_1(%arg0: i32) -> (i32, i32) {
    %c0_i32 = arith.constant 0 : i32
    %c0_i32_0 = arith.constant 0 : i32
    %c0_i32_1 = arith.constant 0 : i32
    return %c0_i32, %c0_i32_0 : i32, i32
  }
  func.func @transform_2(%arg0: i32) -> (i32, i32) {
    %c0_i32 = arith.constant 0 : i32
    %c0_i32_0 = arith.constant 0 : i32
    %c0_i32_1 = arith.constant 0 : i32
    return %c0_i32, %c0_i32_0 : i32, i32
  }
  func.func @transform_3(%arg0: i32) -> (i32, i32) {
    %c0_i32 = arith.constant 0 : i32
    %c0_i32_0 = arith.constant 0 : i32
    return %arg0, %c0_i32 : i32, i32
  }
}

</mosaic_0001>

<bundles_post_ra>
// kernel: tpu_custom_call.1
= control target key start
LH: loop header
LB: loop body
LE: loop exit
PB: predicated region body
PF: predicated region fallthrough
CT: control target
= control target key end

     0   :  { %8 = vsyncpa [#allocation3], 0  ;;  %s781_s0 = inlined_call_operand.vmem [shape: f32[32,215], index: 0, kind: input, shape index: {}]   ;;  %s782_s1 = inlined_call_operand.vmem [shape: f32[215,64], index: 1, kind: input, shape index: {}]   ;;  %s783_s2 = inlined_call_operand.vmem [shape: f32[1,64], index: 2, kind: input, shape index: {}]   ;;  %s784_s3 = inlined_call_operand.hbm [shape: f32[32,64], index: 3, kind: output, shape index: {}]  }
   0x1   :  { %10 = vsyncpa [#allocation3 + $0x1], 0  ;;  %s581_s12 = smov 0   ;;  %s583_s13 = smov 0  }
   0x2   :  { %s585_s14 = smov 0   ;;  %s587_s15 = smov 0  }
   0x3 LB: > { %s602_s16 = sadd.s32 4294967295, %s556_s15   ;;  %s411_s17 = sadd.s32 4294967294, %s556_s15   ;;  %s556_s15 = sphi %s587_s15, %s790_s15   ;;  %s552_s14 = sphi %s585_s14, %s789_s14   ;;  %s548_s13 = sphi %s583_s13, %s788_s13   ;;  %s544_s12 = sphi %s581_s12, %s787_s12  }
   0x4   : > { %s606_s18 = sadd.s32 1, %s556_s15   ;;  %s91_s19 = sadd.s32 1, %s552_s14 }
   0x5   : > { %s88_s20 = ssub.s32 %s556_s15, %s606_s18  ;;  %p101_p0 = scmp.ne.s32.totalorder %s552_s14, %s548_s13 }
   0x6   : > { %p89_p1 = scmp.eq.s32.totalorder %s88_s20, 0  ;;  %p102_p2 = scmp.eq.s32.totalorder %s602_s16, 1 }
   0x7   : > { %p107_p3 = scmp.ne.s32.totalorder %s548_s13, %s544_s12  ;;  %p108_p4 = scmp.eq.s32.totalorder %s411_s17, 1 }
   0x8   : > { %s617_s21 = scalar_select %p89_p1, %s552_s14, %s91_s19  }
   0x9   : > { %p619_p5 = por %p102_p2, %p101_p0  ;;  %p623_p6 = por %p108_p4, %p107_p3 }
   0xa   : > { %p414_p7 = scmp.ge.s32.totalorder %s556_s15, 1  ;;  %p142_p8 = scmp.lt.s32.totalorder %s556_s15, 3 }
   0xc   : > { %p143_p9 = pnand %p414_p7, %p142_p8 }
   0xd   : > { %s416_s24 = sshll.u32 (!%p143_p9), %s602_s16, 1  ;;  %s164_s4 = sand.u32 (!%p143_p9), 1, %s548_s13  }
   0xe   : > { %146 = sbr.rel (%p143_p9) target bundleno = 441 (0x1b9), region = 32  ;;  %p168_p10 = scmp.lt.s32.totalorder (!%p143_p9), %s416_s24, 3 }
   0xf   : > { %s415_s5 = sshll.u32 (!%p143_p9), %s164_s4, 4  ;;  %s428_s7 = sshll.u32 (!%p143_p9), %s602_s16, 4 }
  0x10   : > { %s166_s6 = scalar_lea.vmem (!%p143_p9), [#allocation2], %s415_s5  ;;  %s345_s10 = scalar_lea.hbm (!%p143_p9), %s784_s3, %s428_s7 }
  0x11   : > { %s346_s11 = sshll.u32 (!%p143_p9), %s166_s6, 4  ;;  %s348_s17 = sshll.u32 (!%p143_p9), %s345_s10, 4  ;;  %s347_s11 = int_to_ptr.vmem [resolvable:$true] %s346_s11  ;;  %s349_s17 = int_to_ptr.hbm [resolvable:$true] %s348_s17 }
  0x12   : > { %s334_s19 = scalar_lea.sflag (!%p143_p9), [#allocation3], %s164_s4  ;;  %s508_s20 = sshra.s32 (!%p143_p9), %s349_s17, 4  ;;  %s509_s20 = int_to_ptr.hbm [resolvable:$true] %s508_s20 }
  0x13   : > { %s792_s24 = smov (!%p168_p10, %s416_s24), 3  ;;  %vm179_vm0 = vcmask 711680   ;;  %v558_v8 = vmov 215.0   ;;  %v256_v12 = vld [vmem:[%s782_s1 + $0x78] sm:$0xff]  ;;  %v255_v13 = vld [vmem:[%s782_s1 + $0x70] sm:$0xff]  ;;  %v254_v14 = vld [vmem:[%s782_s1 + $0x68] sm:$0xff]  ;;  %p515_p0 = scmp.lt.s32.totalorder %s509_s20, %s784_s3 }
  0x14   : > { %s427_s25 = sshll.u32 %s792_s24, 4  ;;  %488 = vrcp.f32 %v558_v8  ;;  %282 = vmatpush.msra.mxu0 %v256_v12  ;;  %429 = vmatpush.msra.mxu2 %v256_v12  ;;  %v253_v16 = vld [vmem:[%s782_s1 + $0x60] sm:$0xff]  ;;  %v252_v35 = vld [vmem:[%s782_s1 + $0x58] sm:$0xff]  ;;  %v251_v36 = vld [vmem:[%s782_s1 + $0x50] sm:$0xff]  ;;  %vm278_vm2 = vcmask 1046528   ;;  %vm330_vm9 = vcmask 523264  }
  0x15   : > { %s172_s28 = scalar_lea.vmem %s781_s0, %s427_s25  ;;  %v267_v37 = vld [vmem:[%s782_s1 + $0xd0] sm:$0x7f]  ;;  %v250_v38 = vld [vmem:[%s782_s1 + $0x48] sm:$0xff]  ;;  %v249_v40 = vld [vmem:[%s782_s1 + $0x40] sm:$0xff]  ;;  %s510_s24 = scalar_lea.hbm %s509_s20, 16 }
  0x16   : > { %v175_v0 = vld [vmem:[%s172_s28] sm:$0xff]  ;;  %v176_v1 = vld [vmem:[%s172_s28 + $0x8] sm:$0xff]  ;;  %v178_v4 = vld [vmem:[%s172_s28 + $0x18] sm:$0xff]  ;;  %283 = vmatpush.msra.mxu0 %v255_v13  ;;  %430 = vmatpush.msra.mxu2 %v255_v13  ;;  %p511_p11 = scmp.ne.s32.totalorder %s509_s20, %s510_s24  ;;  %s514_s26 = scalar_lea.hbm %s784_s3, 32 }
  0x17   : > { %v180_v2 = vsel %vm179_vm0, %v176_v1, 0.0  ;;  %v177_v5 = vld [vmem:[%s172_s28 + $0x10] sm:$0xff]  ;;  %v184_v6 = vsel %vm179_vm0, %v178_v4, 0.0  ;;  %419 = vmatpush.msk.msra.mxu1 %vm278_vm2, %v267_v37  ;;  %v266_v39 = vld [vmem:[%s782_s1 + $0xc8] sm:$0xff]  ;;  %v265_v41 = vld [vmem:[%s782_s1 + $0xc0] sm:$0xff]  ;;  %p516_p1 = scmp.lt.s32.totalorder %s514_s26, %s510_s24 }
  0x18   : > { %v181_v3 = vadd.f32 %v180_v2, %v175_v0  ;;  %v185_v7 = vadd.f32 %v184_v6, %v177_v5  ;;  %284 = vmatpush.msra.mxu0 %v254_v14  ;;  %431 = vmatpush.msra.mxu2 %v254_v14  ;;  %v248_v42 = vld [vmem:[%s782_s1 + $0x38] sm:$0xff]  ;;  %v247_v44 = vld [vmem:[%s782_s1 + $0x30] sm:$0xff]  ;;  %v246_v46 = vld [vmem:[%s782_s1 + $0x28] sm:$0xff]  ;;  %p512_p12 = pnand %p511_p11, %p619_p5 }
  0x19   : > { %311 = vmatpush.msra.mxu1 %v266_v39  ;;  %v264_v43 = vld [vmem:[%s782_s1 + $0xb8] sm:$0xff]  ;;  %v263_v45 = vld [vmem:[%s782_s1 + $0xb0] sm:$0xff]  ;;  %v262_v47 = vld [vmem:[%s782_s1 + $0xa8] sm:$0xff]  ;;  %p517_p2 = por %p516_p1, %p515_p0 }
  0x1a   : > { %182 = vadd.xlane.f32.xlu0 %v181_v3  ;;  %v489_v9 = vpop.eup %488  ;;  %285 = vmatpush.msra.mxu0 %v253_v16  ;;  %v245_v48 = vld [vmem:[%s782_s1 + $0x20] sm:$0xff]  ;;  %v244_v50 = vld [vmem:[%s782_s1 + $0x18] sm:$0xff]  ;;  %v243_v52 = vld [vmem:[%s782_s1 + $0x10] sm:$0xff]  ;;  %p513_p13 = pneg %p512_p12 }
  0x1b   : > { %v189_v10 = vmul.f32 215.0, %v489_v9  ;;  %432 = vmatpush.msra.mxu2 %v253_v16  ;;  %vm193_vm1 = vweird.f32 %v489_v9  ;;  %312 = vmatpush.msra.mxu1 %v265_v41  ;;  %v261_v49 = vld [vmem:[%s782_s1 + $0xa0] sm:$0xff]  ;;  %v260_v51 = vld [vmem:[%s782_s1 + $0x98] sm:$0xff]  ;;  %v259_v53 = vld [vmem:[%s782_s1 + $0x90] sm:$0xff] }
  0x1c   : > { %286 = vmatpush.msra.mxu0 %v252_v35  ;;  %v242_v54 = vld [vmem:[%s782_s1 + $0x8] sm:$0xff]  ;;  %v241_v56 = vld [vmem:[%s782_s1] sm:$0xff]  ;;  %p518_p3 = pnand %p517_p2, %p513_p13 }
  0x1d   : > { %v190_v11 = vsub.f32 1.0, %v189_v10  ;;  %433 = vmatpush.msra.mxu2 %v252_v35  ;;  %313 = vmatpush.msra.mxu1 %v264_v43  ;;  %v258_v55 = vld [vmem:[%s782_s1 + $0x88] sm:$0xff]  ;;  %v257_v57 = vld [vmem:[%s782_s1 + $0x80] sm:$0xff] }
  0x1e   : > { %287 = vmatpush.msra.mxu0 %v251_v36 }
  0x1f   : > { %v191_v15 = vmul.f32 %v489_v9, %v190_v11  ;;  %434 = vmatpush.msra.mxu2 %v251_v36  ;;  %314 = vmatpush.msra.mxu1 %v263_v45 }
  0x20   : > { %288 = vmatpush.msra.mxu0 %v250_v38 }
  0x21   : > { %v192_v17 = vadd.f32 %v489_v9, %v191_v15  ;;  %435 = vmatpush.msra.mxu2 %v250_v38  ;;  %315 = vmatpush.msra.mxu1 %v262_v47 }
  0x22   : > { %186 = vadd.xlane.f32.xlu0 %v185_v7  ;;  %289 = vmatpush.msra.mxu0 %v249_v40 }
  0x23   : > { %v647_v18 = vsel %vm193_vm1, %v489_v9, %v192_v17  ;;  %436 = vmatpush.msra.mxu2 %v249_v40  ;;  %316 = vmatpush.msra.mxu1 %v261_v49 }
  0x24   : > { %290 = vmatpush.msra.mxu0 %v248_v42 }
  0x25   : > { %437 = vmatpush.msra.mxu2 %v248_v42  ;;  %317 = vmatpush.msra.mxu1 %v260_v51 }
  0x26   : > { %291 = vmatpush.msra.mxu0 %v247_v44 }
  0x27   : > { %438 = vmatpush.msra.mxu2 %v247_v44  ;;  %318 = vmatpush.msra.mxu1 %v259_v53 }
  0x28   : > { %292 = vmatpush.msra.mxu0 %v246_v46 }
  0x29   : > { %439 = vmatpush.msra.mxu2 %v246_v46  ;;  %319 = vmatpush.msra.mxu1 %v258_v55 }
  0x2a   : > { %293 = vmatpush.msra.mxu0 %v245_v48 }
  0x2b   : > { %440 = vmatpush.msra.mxu2 %v245_v48  ;;  %320 = vmatpush.msra.mxu1 %v257_v57 }
  0x2c   : > { %294 = vmatpush.msra.mxu0 %v244_v50 }
  0x2d   : > { %441 = vmatpush.msra.mxu2 %v244_v50 }
  0x2e   : > { %295 = vmatpush.msra.mxu0 %v243_v52 }
  0x2f   : > { %442 = vmatpush.msra.mxu2 %v243_v52 }
  0x30   : > { %296 = vmatpush.msra.mxu0 %v242_v54 }
  0x31   : > { %443 = vmatpush.msra.mxu2 %v242_v54 }
  0x32   : > { %297 = vmatpush.msra.mxu0 %v241_v56 }
  0x33   : > { %444 = vmatpush.msra.mxu2 %v241_v56 }
  0x8d   : > { %v183_v19 = vpop.xlane.xlu0 %182 }
  0x8e   : > { %v195_v20 = vmul.f32 %v647_v18, %v183_v19 }
  0x90   : > { %v650_v21 = vsub.f32 %v175_v0, %v195_v20  ;;  %v652_v22 = vsub.f32 %v176_v1, %v195_v20 }
  0x92   : > { %v201_v23 = vmul.f32 %v650_v21, %v650_v21  ;;  %v202_v24 = vmul.f32 %v652_v22, %v652_v22 }
  0x94   : > { %v205_v25 = vsel %vm179_vm0, %v202_v24, 0.0 }
  0x95   : > { %v187_v26 = vpop.xlane.xlu0 %186  ;;  %v206_v27 = vadd.f32 %v205_v25, %v201_v23 }
  0x96   : > { %v196_v28 = vmul.f32 %v647_v18, %v187_v26 }
  0x97   : > { %207 = vadd.xlane.f32.xlu1 %v206_v27 }
  0x98   : > { %v660_v29 = vsub.f32 %v177_v5, %v196_v28  ;;  %v662_v30 = vsub.f32 %v178_v4, %v196_v28 }
  0x9a   : > { %v203_v31 = vmul.f32 %v660_v29, %v660_v29  ;;  %v204_v32 = vmul.f32 %v662_v30, %v662_v30 }
  0x9c   : > { %v209_v33 = vsel %vm179_vm0, %v204_v32, 0.0 }
  0x9d   : > { %v210_v34 = vadd.f32 %v209_v33, %v203_v31 }
  0x9f   : > { %211 = vadd.xlane.f32.xlu1 %v210_v34 }
 0x10a   : > { %v208_v58 = vpop.xlane.xlu1 %207 }
 0x10b   : > { %v213_v59 = vmul.f32 %v208_v58, %v647_v18 }
 0x10d   : > { %v215_v60 = vadd.f32 1e-05, %v213_v59 }
 0x10f   : > { %490 = vrsqrt.f32 %v215_v60  ;;  %vm223_vm4 = vweird.f32 %v215_v60 }
 0x112   : > { %v212_v61 = vpop.xlane.xlu1 %211 }
 0x113   : > { %v214_v62 = vmul.f32 %v212_v61, %v647_v18  ;;  %v487_v18 = vld [vmem:[%s783_s2] ss:$0 sm:$0xff] }
 0x115   : > { %v491_v63 = vpop.eup %490  ;;  %v216_v0 = vadd.f32 1e-05, %v214_v62 }
 0x116   : > { %v218_v1 = vmul.f32 %v491_v63, %v215_v60  ;;  %vm224_vm3 = vweird.f32 %v491_v63 }
 0x117   : > { %492 = vrsqrt.f32 %v216_v0  ;;  %vm225_vm5 = vmor %vm223_vm4, %vm224_vm3  ;;  %vm233_vm7 = vweird.f32 %v216_v0 }
 0x118   : > { %v219_v2 = vmul.f32 %v491_v63, %v218_v1 }
 0x11a   : > { %v220_v3 = vmul.f32 0.5, %v219_v2 }
 0x11c   : > { %v221_v4 = vsub.f32 1.5, %v220_v3 }
 0x11d   : > { %v493_v5 = vpop.eup %492 }
 0x11e   : > { %v228_v6 = vmul.f32 %v493_v5, %v216_v0  ;;  %v222_v7 = vmul.f32 %v491_v63, %v221_v4  ;;  %vm234_vm6 = vweird.f32 %v493_v5 }
 0x11f   : > { %vm235_vm8 = vmor %vm233_vm7, %vm234_vm6 }
 0x120   : > { %v229_v8 = vmul.f32 %v493_v5, %v228_v6  ;;  %v226_v9 = vsel %vm225_vm5, %v491_v63, %v222_v7 }
 0x121   : > { %v237_v10 = vmul.f32 %v226_v9, %v650_v21  ;;  %v238_v11 = vmul.f32 %v226_v9, %v652_v22 }
 0x122   : > { %v230_v12 = vmul.f32 0.5, %v229_v8 }
 0x123   : > { %298 = vmatmul.f32.vlgmr.msra.gmra.mxu0 %v237_v10  ;;  %420 = vmatmul.msk.f32.vlgmr.msra.gmra.mxu1 %vm179_vm0, %v238_v11 }
 0x124   : > { %v231_v13 = vsub.f32 1.5, %v230_v12 }
 0x126   : > { %v232_v14 = vmul.f32 %v493_v5, %v231_v13 }
 0x128   : > { %v236_v15 = vsel %vm235_vm8, %v493_v5, %v232_v14 }
 0x129   : > { %v239_v16 = vmul.f32 %v236_v15, %v660_v29  ;;  %v240_v17 = vmul.f32 %v236_v15, %v662_v30 }
 0x12b   : > { %301 = vmatmul.f32.vlgmr.msra.gmra.mxu2 %v239_v16  ;;  %421 = vmatmul.msk.f32.gmra.mxu1 %vm179_vm0, %v240_v17 }
 0x1a0   : > { %v299_v19 = vpop.f32.mrf.mxu0  ;;  %v322_v21 = vpop.f32.mrf.mxu1 }
 0x1a1   : > { %v300_v20 = vadd.f32 %v487_v18, %v299_v19 }
 0x1a3   : > { %v323_v22 = vadd.f32 %v322_v21, %v300_v20 }
 0x1a5   : > { %v328_v23 = vmax.f32 %v323_v22, 0.0 }
 0x1a7   : > { %331 = vst.msk [vmem:[%s166_s6] sm:$0xff] %vm330_vm9, %v328_v23 }
 0x1a8   : > { %v325_v26 = vpop.f32.mrf.mxu1 }
 0x1ae   : > { %v302_v24 = vpop.f32.mrf.mxu2 }
 0x1af   : > { %v303_v25 = vadd.f32 %v487_v18, %v302_v24 }
 0x1b1   : > { %v326_v27 = vadd.f32 %v325_v26, %v303_v25 }
 0x1b3   : > { %v329_v28 = vmax.f32 %v326_v27, 0.0 }
 0x1b5   : > { %332 = vst.msk [vmem:[%s166_s6 + $0x8] sm:$0xff] %vm330_vm9, %v329_v28 }
 0x1b6   : > { %521 = shalt.err (!%p518_p3)
}
 0x1b7   : > { %s559_s29 = smov 128   ;;  %s560_s30 = smov 8  }
 0x1b8   : > { %445 = dma.vmem_to_hbm [thread:$0]  (%p619_p5), %s347_s11, 256, %s349_s17, %s334_s19, %s559_s29, %s559_s29, %s560_s30  }
 0x1b9 PF: > { %p451_p4 = scmp.ge.s32.totalorder %s556_s15, 2  ;;  %s363_s4 = sand.u32 1, %s544_s12  }
 0x1ba   : > { %s364_s5 = scalar_lea.sflag [#allocation3], %s363_s4 }
 0x1bb   : > { %p448_p7 = pnand %p451_p4, %p623_p6 }
 0x1bd   : > { %p449_p8 = pneg %p448_p7 }
 0x1bf   : > { %539 = dma.done.wait (%p449_p8), %s364_s5, 256  }
 0x1c0   : > { %541 = vsyncadd (%p449_p8), %s364_s5, 4294967040  ;;  %p13_p9 = scmp.ge.s32.totalorder %s606_s18, 4   ;;  %s787_s12 = smov %s548_s13 }
 0x1c1   : > { %s788_s13 = smov %s552_s14  ;;  %s789_s14 = smov %s617_s21 }
 0x1c2   : > { %s790_s15 = smov %s606_s18  ;;  %15 = sbr.rel (!%p13_p9) target bundleno = 3 (0x3), region = 67 }
 0x1c7   :  { %370 = vsyncpa [#allocation3], 1 }
 0x1c8   :  { %372 = vsyncpa [#allocation3 + $0x1], 1 }

</bundles_post_ra>
